<compile_context>
chip_gen: v7x
topology: tpu7x:2x2x1
jax: 0.10.0
libtpu: 0.0.40
codegen_flags: <defaults>
</compile_context>

<pallas_src>
import jax
import jax.numpy as jnp
from jax import lax
from jax.experimental import pallas as pl
from jax.experimental.pallas import tpu as pltpu


def _round_up(x, m):
    return (x + m - 1) // m * m


# ---------------------------------------------------------------------------
# Kernel 1: brute-force K=1 nearest face-center (pytorch3d ops.knn_points K=1)
# ---------------------------------------------------------------------------
def _knn_kernel(x_ref, c_ref, d2_ref, idx_ref):
    """Streaming fused min/argmin over all face centers.

    x_ref:   (P, 8, 3)           query points, 8-point sub-chunks on sublanes
    c_ref:   (n_fchunks, 3, FL)  face centers, lane-major, fully VMEM resident
    d2_ref:  (P, 8, 1)           best squared distance per point
    idx_ref: (P, 8, 1)           argmin face index per point (first occurrence)
    """
    n_psub = x_ref.shape[0]
    n_fchunks, _, fl = c_ref.shape

    lane_iota = lax.broadcasted_iota(jnp.int32, (1, fl), 1)   # hoisted

    @pl.loop(0, n_psub)
    def _(p):
        xs = x_ref[p]                                 # (8, 3)
        x0 = xs[:, 0:1]                               # (8, 1) each — loop
        x1 = xs[:, 1:2]                               # invariant w.r.t. faces
        x2 = xs[:, 2:3]

        def face_body(f, carry):
            best_d2, best_chunk = carry               # (8, fl) vreg-resident
            cf = c_ref[f]                             # (3, fl) lane-major chunk
            d0 = x0 - cf[0:1, :]
            d1 = x1 - cf[1:2, :]
            d2 = x2 - cf[2:3, :]
            dist = d0 * d0 + d1 * d1 + d2 * d2        # (8, fl)
            better = dist < best_d2                   # strict '<' keeps first hit
            best_d2 = jnp.where(better, dist, best_d2)
            best_chunk = jnp.where(better, f, best_chunk)   # scalar select operand
            return best_d2, best_chunk

        init = (jnp.full((8, fl), jnp.inf, jnp.float32),
                jnp.zeros((8, fl), jnp.int32))
        if n_fchunks <= 8:
            best_d2, best_chunk = lax.fori_loop(0, n_fchunks, face_body, init,
                                                unroll=True)
        else:
            best_d2, best_chunk = lax.fori_loop(0, n_fchunks, face_body, init)

        # Lane l of the carry tracks faces {g*fl + l}; recover indices once.
        best_idx = best_chunk * fl + lane_iota                       # (8, fl)
        row_min = jnp.min(best_d2, axis=1, keepdims=True)            # (8, 1)
        cand = jnp.where(best_d2 <= row_min, best_idx, jnp.int32(2 ** 30))
        row_idx = jnp.min(cand, axis=1, keepdims=True)               # (8, 1)
        d2_ref[p] = row_min
        idx_ref[p] = row_idx


def knn_nearest_face(points_flat, centers, *, tile_m=512, face_chunk=512):
    """points_flat: (M, 3) f32, centers: (NF, 3) f32 -> (d2 (M,), idx (M,) i32)."""
    m = points_flat.shape[0]
    nf = centers.shape[0]

    tile_m = _round_up(max(tile_m, 128), 128)
    m128 = _round_up(max(m, 1), 128)
    if m128 >= 256:
        # keep >= 2 point tiles so the "parallel" axis feeds both v7x TensorCores
        tm = min(tile_m, _round_up(m128 // 2, 128))
    else:
        tm = m128
    m_pad = _round_up(m, tm)
    num_m = m_pad // tm

    fl = min(_round_up(max(face_chunk, 128), 128), _round_up(nf, 128))
    nf_pad = _round_up(nf, fl)
    n_fchunks = nf_pad // fl

    # Points: 8-point sub-chunks on sublanes, xyz on (padded) lanes.
    x_pad = jnp.zeros((m_pad, 3), jnp.float32).at[:m].set(
        points_flat.astype(jnp.float32))
    x_pad = x_pad.reshape(m_pad // 8, 8, 3)

    # Centers: lane-major, pre-chunked; padded faces get a huge sentinel coord
    # so they can never win the running min.
    c_pad = jnp.full((nf_pad, 3), 1e8, jnp.float32).at[:nf].set(
        centers.astype(jnp.float32))
    c_chunks = c_pad.reshape(n_fchunks, fl, 3).transpose(0, 2, 1)  # (n_fchunks,3,fl)

    d2, idx = pl.pallas_call(
        _knn_kernel,
        out_shape=(jax.ShapeDtypeStruct((m_pad // 8, 8, 1), jnp.float32),
                   jax.ShapeDtypeStruct((m_pad // 8, 8, 1), jnp.int32)),
        grid_spec=pltpu.PrefetchScalarGridSpec(
            num_scalar_prefetch=0,
            grid=(num_m,),
            in_specs=[pl.BlockSpec((tm // 8, 8, 3), lambda i: (i, 0, 0)),
                      # constant index_map: centers fetched once, stay resident
                      pl.BlockSpec((n_fchunks, 3, fl), lambda i: (0, 0, 0))],
            out_specs=[pl.BlockSpec((tm // 8, 8, 1), lambda i: (i, 0, 0)),
                       pl.BlockSpec((tm // 8, 8, 1), lambda i: (i, 0, 0))]),
        compiler_params=pltpu.CompilerParams(
            dimension_semantics=("parallel",),
            vmem_limit_bytes=32 * 1024 * 1024),
    )(x_pad, c_chunks)

    return d2.reshape(-1)[:m], idx.reshape(-1)[:m]


# ---------------------------------------------------------------------------
# Kernel 2: barycentric interpolation (_interp_bary), lane-major layout
# ---------------------------------------------------------------------------
def _interp_bary_kernel(tri_ref, vw_ref, out_ref):
    tri = tri_ref[...]                   # (3 corners, 3 xyz, TM)
    vw = vw_ref[...]                     # (2, TM)
    w0 = vw[0:1, :]
    w1 = vw[1:2, :]
    w2 = 1.0 - w0 - w1
    out_ref[...] = tri[0] * w0 + tri[1] * w1 + tri[2] * w2   # (3, TM)


def interp_bary_lane_major(tri_t, vw_t, *, tile_m=2048):
    """tri_t: (3, 3, M) f32 lane-major, vw_t: (2, M) f32 -> (3, M) f32."""
    m = tri_t.shape[-1]
    tm = min(_round_up(max(tile_m, 128), 128), _round_up(m, 128))
    m_pad = _round_up(m, tm)
    if m_pad != m:
        tri_t = jnp.pad(tri_t, ((0, 0), (0, 0), (0, m_pad - m)))
        vw_t = jnp.pad(vw_t, ((0, 0), (0, m_pad - m)))

    out = pl.pallas_call(
        _interp_bary_kernel,
        out_shape=jax.ShapeDtypeStruct((3, m_pad), jnp.float32),
        grid_spec=pltpu.PrefetchScalarGridSpec(
            num_scalar_prefetch=0,
            grid=(m_pad // tm,),
            in_specs=[pl.BlockSpec((3, 3, tm), lambda i: (0, 0, i)),
                      pl.BlockSpec((2, tm), lambda i: (0, i))],
            out_specs=pl.BlockSpec((3, tm), lambda i: (0, i))),
        compiler_params=pltpu.CompilerParams(
            dimension_semantics=("parallel",)),
    )(tri_t.astype(jnp.float32), vw_t.astype(jnp.float32))
    return out[:, :m]


# ---------------------------------------------------------------------------
# Module port
# ---------------------------------------------------------------------------
class PhongSurfacePallas:
    """JAX/Pallas port of PhongSurfacePy3d.forward == find_corres_spt."""

    def __init__(self, V, F, N, max_dist=float("inf")):
        self.V = jnp.asarray(V, jnp.float32)
        self.F = jnp.asarray(F, jnp.int32)        # torch.long -> int32 on TPU
        self.N = jnp.asarray(N, jnp.float32)
        self.max_dist = float(max_dist)
        # Lane-major tables so tri-vertex gathers land directly in kernel layout.
        self.V_t = self.V.T                        # (3, NV)
        self.N_t = self.N.T                        # (3, NV)
        # F_centers = V[F].mean(dim=1)
        self.F_centers = jnp.mean(self.V[self.F], axis=1)
        # TODO(synk): triwalk.Triwalk (compiled C++ mesh-walking extension) has
        # no Pallas equivalent; it is omitted.

    def init_corres_spt(self, x):
        b, n, _ = x.shape
        d2, idx = knn_nearest_face(x.reshape(-1, 3), self.F_centers)
        d2 = d2.reshape(b, n)
        spt_fidx = idx.reshape(b, n)
        # sqrt(d2) > max_dist  <=>  d2 > max_dist**2 (no sqrt needed in-kernel).
        outlier_mask = d2 > (self.max_dist ** 2)
        spt_vw = jnp.full((b, n, 2), 1.0 / 3.0, jnp.float32)
        return spt_fidx, spt_vw, outlier_mask

    def _gather_tri_lane_major(self, table_t, spt_fidx):
        # table_t: (3, NV) pre-transposed -> gather produces (3 corners, 3 xyz, M)
        tri_F = self.F[spt_fidx.reshape(-1)]                       # (M, 3)
        return jnp.stack([table_t[:, tri_F[:, 0]],
                          table_t[:, tri_F[:, 1]],
                          table_t[:, tri_F[:, 2]]], axis=0)        # (3, 3, M)

    def retrieve_vertices(self, spt_fidx, spt_vw):
        lead = spt_fidx.shape
        tri_t = self._gather_tri_lane_major(self.V_t, spt_fidx)
        vw_t = spt_vw.reshape(-1, 2).T
        out = interp_bary_lane_major(tri_t, vw_t)                  # (3, M)
        return out.T.reshape(*lead, 3)

    def retrieve_normals(self, spt_fidx, spt_vw):
        lead = spt_fidx.shape
        tri_t = self._gather_tri_lane_major(self.N_t, spt_fidx)
        vw_t = spt_vw.reshape(-1, 2).T
        out = interp_bary_lane_major(tri_t, vw_t).T.reshape(*lead, 3)
        return out / jnp.maximum(jnp.linalg.norm(out, axis=-1, keepdims=True), 1e-12)

    def forward(self, verts, norms=None):
        # find_corres_spt with num_init=1 (default forward path)
        spt_fidx, spt_vw, outlier_mask = self.init_corres_spt(verts)
        # TODO(synk): update_corres_spt (500-step Adam/Adagrad inner optimisation
        # plus host-side triwalk surface walking) has no clean Pallas equivalent;
        # returned spt_vw is the KNN initialisation (1/3, 1/3).
        return spt_fidx, spt_vw, outlier_mask


if __name__ == "__main__":
    key = jax.random.PRNGKey(0)
    k_v, k_f, k_n, k_x, k_w, k_big = jax.random.split(key, 6)

    NV, NF = 48, 200         # vertices / faces of the synthetic mesh
    B, NPTS = 2, 33          # query points: [B, N, 3]  (M = 66, pads to 128)

    V = jax.random.normal(k_v, (NV, 3), jnp.float32)
    F = jax.random.randint(k_f, (NF, 3), 0, NV, jnp.int32)
    Nrm = jax.random.normal(k_n, (NV, 3), jnp.float32)
    Nrm = Nrm / jnp.linalg.norm(Nrm, axis=-1, keepdims=True)

    surf = PhongSurfacePallas(V, F, Nrm)
    x = jax.random.normal(k_x, (B, NPTS, 3), jnp.float32)

    spt_fidx, spt_vw, outlier_mask = surf.forward(x)
    jax.block_until_ready((spt_fidx, spt_vw, outlier_mask))

    # Exercise the interp kernel through retrieve_vertices / retrieve_normals.
    match_v = surf.retrieve_vertices(spt_fidx, spt_vw)
    match_n = surf.retrieve_normals(spt_fidx, spt_vw)
    jax.block_until_ready((match_v, match_n))

    # --- sanity checks against plain-JAX references ---
    pts = x.reshape(-1, 3)
    ref_d2 = jnp.sum((pts[:, None, :] - surf.F_centers[None, :, :]) ** 2, axis=-1)
    ref_min = jnp.min(ref_d2, axis=-1)
    ref_idx = jnp.argmin(ref_d2, axis=-1).astype(jnp.int32)

    # default path (single face chunk)
    d2_a, idx_a = knn_nearest_face(pts, surf.F_centers)
    assert jnp.allclose(d2_a, ref_min, atol=1e-4, rtol=1e-5), "KNN d2 mismatch"
    assert jnp.all(idx_a == ref_idx), "KNN idx mismatch"

    # streaming multi-face-chunk running-min path
    d2_b, idx_b = knn_nearest_face(pts, surf.F_centers, tile_m=128, face_chunk=128)
    assert jnp.allclose(d2_b, ref_min, atol=1e-4, rtol=1e-5), "chunked KNN d2 mismatch"
    assert jnp.all(idx_b == ref_idx), "chunked KNN idx mismatch"

    # multiple point tiles + point/face padding path
    pts_big = jax.random.normal(k_big, (600, 3), jnp.float32)
    ref_d2b = jnp.sum((pts_big[:, None, :] - surf.F_centers[None, :, :]) ** 2, axis=-1)
    d2_c, idx_c = knn_nearest_face(pts_big, surf.F_centers, tile_m=256, face_chunk=128)
    assert jnp.allclose(d2_c, jnp.min(ref_d2b, axis=-1), atol=1e-4, rtol=1e-5), \
        "multi-tile KNN d2 mismatch"
    assert jnp.all(idx_c == jnp.argmin(ref_d2b, axis=-1).astype(jnp.int32)), \
        "multi-tile KNN idx mismatch"

    # interp_bary vs einsum reference (uniform and random barycentric weights)
    for vw_test in (spt_vw, jax.random.uniform(k_w, (B, NPTS, 2), jnp.float32, 0.0, 0.5)):
        bary = jnp.concatenate(
            [vw_test, 1.0 - vw_test[..., :1] - vw_test[..., 1:2]], axis=-1)
        tri_v = surf.V[surf.F[spt_fidx]]
        ref_mv = jnp.einsum("bnij,bni->bnj", tri_v, bary)
        got_mv = surf.retrieve_vertices(spt_fidx, vw_test)
        assert jnp.allclose(got_mv, ref_mv, atol=1e-5), "interp_bary mismatch"

    assert spt_fidx.shape == (B, NPTS) and spt_fidx.dtype == jnp.int32
    assert spt_vw.shape == (B, NPTS, 2) and spt_vw.dtype == jnp.float32
    assert outlier_mask.shape == (B, NPTS) and outlier_mask.dtype == jnp.bool_

    print("KERNEL_OK")
</pallas_src>

<mosaic_0001>
module attributes {stable_mosaic.version = 11 : i64} {
  func.func @_knn_kernel(%arg0: i32, %arg1: memref<16x8x3xf32, #tpu.memory_space<vmem>>, %arg2: memref<1x3x256xf32, #tpu.memory_space<vmem>>, %arg3: memref<16x8x1xf32, #tpu.memory_space<vmem>>, %arg4: memref<16x8x1xi32, #tpu.memory_space<vmem>>) attributes {dimension_semantics = [#tpu.dimension_semantics<parallel>], iteration_bounds = array<i64: 1>, scalar_prefetch = 0 : i64, scratch_operands = 0 : i64, tpu.core_type = #tpu.core_type<tc>, window_params = [{transform_indices = @transform_0, window_bounds = array<i64: 16, 8, 3>}, {pipeline_mode = #tpu.pipeline_mode<synchronous>, transform_indices = @transform_1, window_bounds = array<i64: 1, 3, 256>}, {transform_indices = @transform_2, window_bounds = array<i64: 16, 8, 1>}, {transform_indices = @transform_3, window_bounds = array<i64: 16, 8, 1>}]} {
    %0 = tpu.iota {dimensions = array<i32: 1>} : vector<1x256xi32>
    %c0_i32 = arith.constant 0 : i32
    %c16_i32 = arith.constant 16 : i32
    %1 = arith.addi %c0_i32, %c16_i32 : i32
    %c1_i32 = arith.constant 1 : i32
    scf.for %arg5 = %c0_i32 to %1 step %c1_i32  : i32 {
      %c1_i32_1 = arith.constant 1 : i32
      %2 = arith.muli %arg5, %c1_i32_1 : i32
      %c0_i32_2 = arith.constant 0 : i32
      %3 = arith.addi %c0_i32_2, %2 : i32
      %4 = arith.index_cast %3 : i32 to index
      %c0 = arith.constant 0 : index
      %c0_3 = arith.constant 0 : index
      %5 = vector.load %arg1[%4, %c0, %c0_3] : memref<16x8x3xf32, #tpu.memory_space<vmem>>, vector<1x8x3xf32>
      %6 = vector.shape_cast %5 : vector<1x8x3xf32> to vector<8x3xf32>
      %7 = vector.extract_strided_slice %6 {offsets = [0, 0], sizes = [8, 1], strides = [1, 1]} : vector<8x3xf32> to vector<8x1xf32>
      %8 = vector.extract_strided_slice %6 {offsets = [0, 1], sizes = [8, 1], strides = [1, 1]} : vector<8x3xf32> to vector<8x1xf32>
      %9 = vector.extract_strided_slice %6 {offsets = [0, 2], sizes = [8, 1], strides = [1, 1]} : vector<8x3xf32> to vector<8x1xf32>
      %cst = arith.constant 0x7F800000 : f32
      %10 = vector.broadcast %cst : f32 to vector<8x256xf32>
      %c0_i32_4 = arith.constant 0 : i32
      %11 = vector.broadcast %c0_i32_4 : i32 to vector<8x256xi32>
      %c0_i32_5 = arith.constant 0 : i32
      %12 = arith.index_cast %c0_i32_5 : i32 to index
      %c0_6 = arith.constant 0 : index
      %c0_7 = arith.constant 0 : index
      %13 = vector.load %arg2[%12, %c0_6, %c0_7] : memref<1x3x256xf32, #tpu.memory_space<vmem>>, vector<1x3x256xf32>
      %14 = vector.shape_cast %13 : vector<1x3x256xf32> to vector<3x256xf32>
      %15 = vector.extract_strided_slice %14 {offsets = [0, 0], sizes = [1, 256], strides = [1, 1]} : vector<3x256xf32> to vector<1x256xf32>
      %16 = vector.broadcast %7 : vector<8x1xf32> to vector<8x256xf32>
      %17 = vector.broadcast %15 : vector<1x256xf32> to vector<8x256xf32>
      %18 = arith.subf %16, %17 : vector<8x256xf32>
      %19 = vector.extract_strided_slice %14 {offsets = [1, 0], sizes = [1, 256], strides = [1, 1]} : vector<3x256xf32> to vector<1x256xf32>
      %20 = vector.broadcast %8 : vector<8x1xf32> to vector<8x256xf32>
      %21 = vector.broadcast %19 : vector<1x256xf32> to vector<8x256xf32>
      %22 = arith.subf %20, %21 : vector<8x256xf32>
      %23 = vector.extract_strided_slice %14 {offsets = [2, 0], sizes = [1, 256], strides = [1, 1]} : vector<3x256xf32> to vector<1x256xf32>
      %24 = vector.broadcast %9 : vector<8x1xf32> to vector<8x256xf32>
      %25 = vector.broadcast %23 : vector<1x256xf32> to vector<8x256xf32>
      %26 = arith.subf %24, %25 : vector<8x256xf32>
      %27 = arith.mulf %18, %18 : vector<8x256xf32>
      %28 = arith.mulf %22, %22 : vector<8x256xf32>
      %29 = arith.addf %27, %28 : vector<8x256xf32>
      %30 = arith.mulf %26, %26 : vector<8x256xf32>
      %31 = arith.addf %29, %30 : vector<8x256xf32>
      %32 = arith.cmpf olt, %31, %10 : vector<8x256xf32>
      %33 = arith.select %32, %31, %10 : vector<8x256xi1>, vector<8x256xf32>
      %34 = vector.broadcast %c0_i32_5 : i32 to vector<8x256xi32>
      %35 = arith.select %32, %34, %11 : vector<8x256xi1>, vector<8x256xi32>
      %c1_i32_8 = arith.constant 1 : i32
      %c256_i32 = arith.constant 256 : i32
      %36 = vector.broadcast %c256_i32 : i32 to vector<8x256xi32>
      %37 = arith.muli %35, %36 : vector<8x256xi32>
      %38 = vector.broadcast %0 : vector<1x256xi32> to vector<8x256xi32>
      %39 = arith.addi %37, %38 : vector<8x256xi32>
      %cst_9 = arith.constant dense<0x7F800000> : vector<8xf32>
      %40 = vector.multi_reduction <minimumf>, %33, %cst_9 [1] : vector<8x256xf32> to vector<8xf32>
      %41 = vector.shape_cast %40 : vector<8xf32> to vector<8x1xf32>
      %42 = vector.broadcast %41 : vector<8x1xf32> to vector<8x256xf32>
      %43 = arith.cmpf ole, %33, %42 : vector<8x256xf32>
      %c1073741824_i32 = arith.constant 1073741824 : i32
      %44 = vector.broadcast %c1073741824_i32 : i32 to vector<8x256xi32>
      %45 = arith.select %43, %39, %44 : vector<8x256xi1>, vector<8x256xi32>
      %cst_10 = arith.constant dense<2147483647> : vector<8xi32>
      %46 = vector.multi_reduction <minsi>, %45, %cst_10 [1] : vector<8x256xi32> to vector<8xi32>
      %47 = vector.shape_cast %46 : vector<8xi32> to vector<8x1xi32>
      %48 = arith.index_cast %3 : i32 to index
      %c0_11 = arith.constant 0 : index
      %c0_12 = arith.constant 0 : index
      %49 = vector.load %arg3[%48, %c0_11, %c0_12] : memref<16x8x1xf32, #tpu.memory_space<vmem>>, vector<1x8x1xf32>
      %50 = vector.shape_cast %49 : vector<1x8x1xf32> to vector<8x1xf32>
      %51 = vector.shape_cast %41 : vector<8x1xf32> to vector<1x8x1xf32>
      tpu.vector_store %arg3[%48, %c0_11, %c0_12], %51 {strides = array<i32>} : memref<16x8x1xf32, #tpu.memory_space<vmem>>, vector<1x8x1xf32>,
      %52 = arith.index_cast %3 : i32 to index
      %c0_13 = arith.constant 0 : index
      %c0_14 = arith.constant 0 : index
      %53 = vector.load %arg4[%52, %c0_13, %c0_14] : memref<16x8x1xi32, #tpu.memory_space<vmem>>, vector<1x8x1xi32>
      %54 = vector.shape_cast %53 : vector<1x8x1xi32> to vector<8x1xi32>
      %55 = vector.shape_cast %47 : vector<8x1xi32> to vector<1x8x1xi32>
      tpu.vector_store %arg4[%52, %c0_13, %c0_14], %55 {strides = array<i32>} : memref<16x8x1xi32, #tpu.memory_space<vmem>>, vector<1x8x1xi32>,
    }
    %c16_i32_0 = arith.constant 16 : i32
    return
  }
  func.func @transform_0(%arg0: i32) -> (i32, i32, i32) {
    %c0_i32 = arith.constant 0 : i32
    %c0_i32_0 = arith.constant 0 : i32
    %c0_i32_1 = arith.constant 0 : i32
    return %arg0, %c0_i32, %c0_i32_0 : i32, i32, i32
  }
  func.func @transform_1(%arg0: i32) -> (i32, i32, i32) {
    %c0_i32 = arith.constant 0 : i32
    %c0_i32_0 = arith.constant 0 : i32
    %c0_i32_1 = arith.constant 0 : i32
    %c0_i32_2 = arith.constant 0 : i32
    return %c0_i32, %c0_i32_0, %c0_i32_1 : i32, i32, i32
  }
  func.func @transform_2(%arg0: i32) -> (i32, i32, i32) {
    %c0_i32 = arith.constant 0 : i32
    %c0_i32_0 = arith.constant 0 : i32
    %c0_i32_1 = arith.constant 0 : i32
    return %arg0, %c0_i32, %c0_i32_0 : i32, i32, i32
  }
  func.func @transform_3(%arg0: i32) -> (i32, i32, i32) {
    %c0_i32 = arith.constant 0 : i32
    %c0_i32_0 = arith.constant 0 : i32
    %c0_i32_1 = arith.constant 0 : i32
    return %arg0, %c0_i32, %c0_i32_0 : i32, i32, i32
  }
}

</mosaic_0001>

<bundles_post_ra>
// kernel: tpu_custom_call.1
= control target key start
LH: loop header
LB: loop body
LE: loop exit
PB: predicated region body
PF: predicated region fallthrough
CT: control target
= control target key end

     0   :  { %v13_v0 = vlaneseq  ;;  %s214_s12 = smov 0   ;;  %s245_s0 = inlined_call_operand.vmem [shape: f32[16,8,3], index: 0, kind: input, shape index: {}]   ;;  %s246_s1 = inlined_call_operand.vmem [shape: f32[1,3,256], index: 1, kind: input, shape index: {}]   ;;  %s247_s2 = inlined_call_operand.vmem [shape: f32[16,8,1], index: 2, kind: output, shape index: {0}]   ;;  %s248_s3 = inlined_call_operand.vmem [shape: s32[16,8,1], index: 3, kind: output, shape index: {1}]  }
   0x2   :  { %v209_v1 = vand.u32 127, %v13_v0 }
   0x4   :  { %v212_v2 = vadd.s32 128, %v209_v1 }
   0x5 LB: > { %v185_v3 = vmov 0   ;;  %v186_v4 = vmov 2   ;;  %s220_s13 = sshll.u32 %s183_s12, 3  ;;  %v187_v6 = vmov 1   ;;  %v33_v7 = vshrl.u32 %v13_v0, 7  ;;  %s21_s12 = sadd.s32 1, %s183_s12   ;;  %s183_s12 = sphi %s214_s12, %s21_s12  }
   0x6   : > { %173 = vset.pattern.permute.xlu0 %v185_v3  ;;  %175 = vset.pattern.permute.xlu1 %v186_v4  ;;  %s23_s16 = scalar_lea.vmem %s245_s0, %s220_s13  ;;  %v25_v10 = vld [vmem:[%s246_s1] sm:$0x77]  ;;  %s137_s21 = scalar_lea.vmem %s247_s2, %s220_s13  ;;  %vm138_vm2 = vcmask 7168  }
   0x7   : > { %v24_v5 = vld [vmem:[%s23_s16] sm:$0xff]  ;;  %v34_v8 = vsub.s32 0, %v33_v7  ;;  %v38_v9 = vsub.s32 4, %v33_v7  ;;  %v82_v11 = vsub.s32 2, %v33_v7  ;;  %v86_v12 = vsub.s32 6, %v33_v7  ;;  %s140_s24 = scalar_lea.vmem %s248_s3, %s220_s13  ;;  %p18_p0 = scmp.ge.s32.totalorder %s21_s12, 16  }
   0x8   : > { %28 = vperm.xlu0 %173, %v24_v5   ;;  %77 = vperm.xlu1 %175, %v24_v5   ;;  %v58_v13 = vsub.s32 1, %v33_v7  ;;  %v62_v14 = vsub.s32 5, %v33_v7 }
   0x9   : > { %v35_v15 = vrot.slane %v25_v10, %v34_v8  ;;  %v39_v16 = vrot.slane %v25_v10, %v38_v9  ;;  %v83_v17 = vrot.slane %v25_v10, %v82_v11  ;;  %v87_v18 = vrot.slane %v25_v10, %v86_v12 }
   0xa   : > { %v59_v19 = vrot.slane %v25_v10, %v58_v13  ;;  %v63_v20 = vrot.slane %v25_v10, %v62_v14 }
   0xb   : > { %v45_v21 = vrot.slane %v35_v15, %v34_v8  ;;  %v49_v22 = vrot.slane %v39_v16, %v34_v8  ;;  %v93_v24 = vrot.slane %v83_v17, %v82_v11  ;;  %v97_v25 = vrot.slane %v87_v18, %v82_v11 }
   0xc   : > { %174 = vset.pattern.permute.xlu0 %v187_v6  ;;  %v69_v27 = vrot.slane %v59_v19, %v58_v13  ;;  %v73_v28 = vrot.slane %v63_v20, %v58_v13 }
   0xd   : > { %53 = vperm.xlu0 %174, %v24_v5  }
  0x11   : > { %176 = vset.pattern.permute.xlu0 %v186_v4 }
  0x87   : > { %v29_v23 = vpop.permute.xlu0 %28  ;;  %v78_v26 = vpop.permute.xlu1 %77 }
  0x88   : > { %v50_v29 = vsub.f32 %v29_v23, %v45_v21  ;;  %v51_v30 = vsub.f32 %v29_v23, %v49_v22  ;;  %v98_v31 = vsub.f32 %v78_v26, %v93_v24  ;;  %v99_v32 = vsub.f32 %v78_v26, %v97_v25 }
  0x8a   : > { %v100_v36 = vmul.f32 %v50_v29, %v50_v29  ;;  %v101_v37 = vmul.f32 %v51_v30, %v51_v30  ;;  %v106_v40 = vmul.f32 %v98_v31, %v98_v31  ;;  %v107_v41 = vmul.f32 %v99_v32, %v99_v32 }
  0x8c   : > { %v54_v33 = vpop.permute.xlu0 %53 }
  0x8d   : > { %v74_v34 = vsub.f32 %v54_v33, %v69_v27  ;;  %v75_v35 = vsub.f32 %v54_v33, %v73_v28 }
  0x8f   : > { %v102_v38 = vmul.f32 %v74_v34, %v74_v34  ;;  %v103_v39 = vmul.f32 %v75_v35, %v75_v35 }
  0x91   : > { %v104_v42 = vadd.f32 %v102_v38, %v100_v36  ;;  %v105_v43 = vadd.f32 %v103_v39, %v101_v37 }
  0x93   : > { %v108_v44 = vadd.f32 %v106_v40, %v104_v42  ;;  %v109_v45 = vadd.f32 %v107_v41, %v105_v43 }
  0x95   : > { %vm110_vm0 = vcmp.lt.f32.partialorder %v108_v44, inf  ;;  %vm111_vm1 = vcmp.lt.f32.partialorder %v109_v45, inf }
  0x96   : > { %v112_v46 = vsel %vm110_vm0, %v108_v44, inf  ;;  %v113_v47 = vsel %vm111_vm1, %v109_v45, inf }
  0x97   : > { %v114_v48 = vmin.f32 %v112_v46, %v113_v47 }
  0x99   : > { %115 = vmin.xlane.f32.xlu1 %v114_v48 }
 0x126   : > { %v116_v49 = vpop.xlane.xlu1 %115 }
 0x127   : > { %vm117_vm3 = vcmp.le.f32.partialorder %v112_v46, %v116_v49  ;;  %vm118_vm4 = vcmp.le.f32.partialorder %v113_v47, %v116_v49  ;;  %139 = vst.msk [vmem:[%s137_s21] sm:$0xff] %vm138_vm2, %v116_v49 }
 0x128   : > { %v119_v50 = vsel %vm117_vm3, %v209_v1, 1073741824  ;;  %v120_v51 = vsel %vm118_vm4, %v212_v2, 1073741824 }
 0x129   : > { %vm121_vm5 = vcmp.lt.s32.totalorder %v119_v50, %v120_v51 }
 0x12a   : > { %v122_v52 = vsel %vm121_vm5, %v119_v50, %v120_v51 }
 0x12b   : > { %v124_v53 = vshra.s32 %v122_v52, 16  ;;  %v123_v55 = vand.u32 65535, %v122_v52 }
 0x12d   : > { %v126_v54 = vcvt.s32.f32 %v124_v53  ;;  %v125_v57 = vcvt.s32.f32 %v123_v55 }
 0x12f   : > { %127 = vmin.xlane.f32.xlu0 %v126_v54 }
 0x1bc   : > { %v128_v56 = vpop.xlane.xlu0 %127 }
 0x1bd   : > { %vm129_vm6 = vcmp.eq.f32.partialorder %v126_v54, %v128_v56  ;;  %v134_v59 = vcvt.f32.s32 %v128_v56 }
 0x1be   : > { %v130_v58 = vsel %vm129_vm6, %v125_v57, inf }
 0x1bf   : > { %131 = vmin.xlane.f32.xlu1 %v130_v58  ;;  %v135_v61 = vshll.u32 %v134_v59, 16 }
 0x24b   :  { %20 = sbr.rel (!%p18_p0) target bundleno = 5 (0x5), region = 46 }
 0x24c   : > { %v132_v60 = vpop.xlane.xlu1 %131 }
 0x24d   : > { %v133_v62 = vcvt.f32.s32 %v132_v60 }
 0x24f   : > { %v136_v63 = vadd.s32 %v135_v61, %v133_v62 }
 0x251   : > { %141 = vst.msk [vmem:[%s140_s24] sm:$0xff] %vm138_vm2, %v136_v63 }

</bundles_post_ra>
